<compile_context>
chip_gen: v6e
topology: v6e:2x2x1
jax: 0.10.0
libtpu: 0.0.40
codegen_flags: <defaults>
</compile_context>

<pallas_src>
import functools

import jax
import jax.numpy as jnp
from jax.experimental import pallas as pl
from jax.experimental.pallas import tpu as pltpu

EPS = 1e-5  # nn.BatchNorm2d default eps

# Safe on every generation (raises v5e's 16 MiB default, matches v6e/v7x).
# For large Cin / tiles, raise on v5e/v6e (keep headroom; v7x physical = 64 MiB).
VMEM_LIMIT_BYTES = 32 * 1024 * 1024


def _round_up(x, m):
  return (x + m - 1) // m * m


def _stack_taps(x_ref, tap_ref, *, cin, wp, tile):
  """Copy the 9 shifted tap views into one (9*Cin, TILE) VMEM scratch."""
  for k in range(9):
    dy, dx = divmod(k, 3)
    off = dy * wp + dx
    tap_ref[k * cin:(k + 1) * cin, :] = x_ref[:, off:off + tile]


def stats_kernel(x_ref, w1_ref, mask_ref, stats_ref, tap_ref, *, wp, tile):
  """Pass 1: conv3x3 on one tile -> masked per-channel sum / sumsq.

  x_ref    : (Cin, TILE+HALO) one flat-spatial tile (with halo), channel-major
  w1_ref   : (Cmid, 9*Cin)    stacked 3x3 taps, k = dy*3+dx major, channel minor
  mask_ref : (1, TILE)        1.0 at valid output positions
  stats_ref: (Cmid, 2)        col 0 = sum, col 1 = sumsq (per-tile partials)
  tap_ref  : (9*Cin, TILE)    VMEM scratch for the stacked taps
  """
  cin = x_ref.shape[0]
  _stack_taps(x_ref, tap_ref, cin=cin, wp=wp, tile=tile)
  acc = jnp.dot(w1_ref[...], tap_ref[...],
                preferred_element_type=jnp.float32)        # (Cmid, TILE)
  am = acc * mask_ref[...]                                 # mask^2 == mask
  stats_ref[:, 0:1] = jnp.sum(am, axis=1, keepdims=True)
  stats_ref[:, 1:2] = jnp.sum(am * am, axis=1, keepdims=True)


def apply_kernel(x_ref, w1s_ref, shift_ref, w2_ref, b2_ref, o_ref, tap_ref,
                 *, wp, tile):
  """Pass 2: conv3x3 (BN scale pre-folded) + shift + ReLU + 1x1 + sigmoid.

  x_ref    : (Cin, TILE+HALO)
  w1s_ref  : (Cmid, 9*Cin)  conv1 weight with BN scale folded into the rows
  shift_ref: (Cmid, 1)      beta - mean*scale
  w2_ref   : (Cout, Cmid)   1x1 conv weight
  b2_ref   : (Cout, 1)      1x1 conv bias
  o_ref    : (Cout, TILE)   lane-dense output tile
  tap_ref  : (9*Cin, TILE)  VMEM scratch
  """
  cin = x_ref.shape[0]
  _stack_taps(x_ref, tap_ref, cin=cin, wp=wp, tile=tile)
  pre = jnp.dot(w1s_ref[...], tap_ref[...],
                preferred_element_type=jnp.float32)        # scale * conv3x3
  y = jnp.maximum(pre + shift_ref[...], 0.0)               # BN shift + ReLU
  z = jnp.dot(w2_ref[...], y,
              preferred_element_type=jnp.float32) + b2_ref[...]
  o_ref[...] = jax.nn.sigmoid(z).astype(o_ref.dtype)


def out_conv(x_nchw, w1_oihw, b1, gamma, beta, w2_oihw, b2, *, tile_lanes=512):
  """OutConv forward. x_nchw: (N, Cin, H, W) f32 -> (N, Cout, H, W) f32."""
  del b1  # Redundant: a per-channel bias right before batch-stat BN cancels.
  assert tile_lanes % 128 == 0
  N, Cin, H, W = x_nchw.shape
  Cmid = w1_oihw.shape[0]
  Cout = w2_oihw.shape[0]
  Hp, Wp = H + 2, W + 2
  L = N * Hp * Wp                            # flat padded spatial length
  num_tiles = int(pl.cdiv(L, tile_lanes))
  Ltot = num_tiles * tile_lanes
  halo = _round_up(2 * Wp + 2, 128)          # max tap offset, lane-aligned
  tile_ext = tile_lanes + halo
  count = float(N * H * W)                   # BN statistics population size

  # ---- wrapper glue: channel-major flat layout + overlapped tile extraction
  # (kept as one jit-fused chain; duplication is only halo/tile per tile).
  xp = jnp.pad(x_nchw, ((0, 0), (0, 0), (1, 1), (1, 1)))   # (N, Cin, Hp, Wp)
  xflat = jnp.transpose(xp, (1, 0, 2, 3)).reshape(Cin, L)  # (Cin, L)
  xflat = jnp.pad(xflat, ((0, 0), (0, Ltot + halo - L)))
  xt = jnp.stack(
      [jax.lax.dynamic_slice_in_dim(xflat, t * tile_lanes, tile_ext, axis=1)
       for t in range(num_tiles)], axis=0)                 # (T, Cin, tile_ext)

  # Stacked-tap conv1 weight: row m, col k*Cin + c == w1[m, c, dy, dx], k=dy*3+dx.
  w1s = jnp.transpose(w1_oihw, (0, 2, 3, 1)).reshape(Cmid, 9 * Cin)
  w2m = w2_oihw[:, :, 0, 0]                                # (Cout, Cmid)

  # Validity mask over flat positions (excludes spatial padding and tail lanes).
  mask = jnp.zeros((N, Hp, Wp), jnp.float32).at[:, :H, :W].set(1.0)
  mask = jnp.pad(mask.reshape(1, L), ((0, 0), (0, Ltot - L)))   # (1, Ltot)

  cparams = pltpu.CompilerParams(dimension_semantics=("parallel",),
                                 vmem_limit_bytes=VMEM_LIMIT_BYTES)
  tap_scratch = pltpu.VMEM((9 * Cin, tile_lanes), jnp.float32)

  # ---- pass 1: per-tile partial BN statistics -------------------------------
  stats = pl.pallas_call(
      functools.partial(stats_kernel, wp=Wp, tile=tile_lanes),
      out_shape=jax.ShapeDtypeStruct((num_tiles, Cmid, 2), jnp.float32),
      grid=(num_tiles,),
      in_specs=[
          pl.BlockSpec((None, Cin, tile_ext), lambda t: (t, 0, 0)),
          pl.BlockSpec((Cmid, 9 * Cin), lambda t: (0, 0)),
          pl.BlockSpec((1, tile_lanes), lambda t: (0, t)),
      ],
      out_specs=pl.BlockSpec((None, Cmid, 2), lambda t: (t, 0, 0)),
      scratch_shapes=[tap_scratch],
      compiler_params=cparams,
      cost_estimate=pl.CostEstimate(
          flops=int((2 * 9 * Cin * Cmid + 4 * Cmid) * Ltot),
          transcendentals=0,
          bytes_accessed=int(4 * (num_tiles * Cin * tile_ext + Ltot
                                  + 9 * Cmid * Cin + num_tiles * Cmid * 2))),
  )(xt, w1s, mask)

  # ---- reduce partial stats, fold BN into scale/shift (tiny, plain JAX) -----
  s = jnp.sum(stats[:, :, 0], axis=0)                      # (Cmid,)
  s2 = jnp.sum(stats[:, :, 1], axis=0)
  mean = s / count
  var = s2 / count - mean * mean                           # biased variance
  scale = gamma * jax.lax.rsqrt(var + EPS)
  shift = beta - mean * scale
  w1s_scaled = w1s * scale[:, None]                        # fold scale into conv1

  # ---- pass 2: normalize + ReLU + 1x1 conv + sigmoid ------------------------
  out_flat = pl.pallas_call(
      functools.partial(apply_kernel, wp=Wp, tile=tile_lanes),
      out_shape=jax.ShapeDtypeStruct((Cout, Ltot), jnp.float32),
      grid=(num_tiles,),
      in_specs=[
          pl.BlockSpec((None, Cin, tile_ext), lambda t: (t, 0, 0)),
          pl.BlockSpec((Cmid, 9 * Cin), lambda t: (0, 0)),
          pl.BlockSpec((Cmid, 1), lambda t: (0, 0)),
          pl.BlockSpec((Cout, Cmid), lambda t: (0, 0)),
          pl.BlockSpec((Cout, 1), lambda t: (0, 0)),
      ],
      out_specs=pl.BlockSpec((Cout, tile_lanes), lambda t: (0, t)),
      scratch_shapes=[tap_scratch],
      compiler_params=cparams,
      cost_estimate=pl.CostEstimate(
          flops=int((2 * 9 * Cin * Cmid + 2 * Cmid * Cout
                     + 2 * Cmid + 2 * Cout) * Ltot),
          transcendentals=int(Cout * Ltot),
          bytes_accessed=int(4 * (num_tiles * Cin * tile_ext + Cout * Ltot
                                  + 9 * Cmid * Cin + Cmid + Cout * Cmid + Cout))),
  )(xt, w1s_scaled, shift.reshape(Cmid, 1), w2m, b2.reshape(Cout, 1))

  # Glue: drop padded/invalid positions, convert back to NCHW.
  out = out_flat[:, :L].reshape(Cout, N, Hp, Wp)[:, :, :H, :W]
  return jnp.transpose(out, (1, 0, 2, 3))


def reference(x_nchw, w1_oihw, b1, gamma, beta, w2_oihw, b2):
  """Pure-JAX reference with identical semantics (correctness check)."""
  dn = ("NCHW", "OIHW", "NCHW")
  y = jax.lax.conv_general_dilated(x_nchw, w1_oihw, (1, 1), "SAME",
                                   dimension_numbers=dn)
  y = y + b1.reshape(1, -1, 1, 1)
  mean = jnp.mean(y, axis=(0, 2, 3), keepdims=True)
  var = jnp.mean((y - mean) ** 2, axis=(0, 2, 3), keepdims=True)
  y = (y - mean) / jnp.sqrt(var + EPS)
  y = y * gamma.reshape(1, -1, 1, 1) + beta.reshape(1, -1, 1, 1)
  y = jnp.maximum(y, 0.0)
  z = jax.lax.conv_general_dilated(y, w2_oihw, (1, 1), "VALID",
                                   dimension_numbers=dn)
  z = z + b2.reshape(1, -1, 1, 1)
  return jax.nn.sigmoid(z)


if __name__ == "__main__":
  # Shapes consistent with OutConv(in_channels=8, out_channels=3).
  N, Cin, H, W = 2, 8, 16, 16
  Cmid, Cout = Cin // 2, 3

  key = jax.random.PRNGKey(0)
  k1, k2, k3, k4, kx = jax.random.split(key, 5)

  w1 = jax.random.normal(k1, (Cmid, Cin, 3, 3), jnp.float32) * 0.1
  b1 = jax.random.normal(k2, (Cmid,), jnp.float32) * 0.1
  gamma = jnp.ones((Cmid,), jnp.float32)   # BatchNorm2d default weight
  beta = jnp.zeros((Cmid,), jnp.float32)   # BatchNorm2d default bias
  w2 = jax.random.normal(k3, (Cout, Cmid, 1, 1), jnp.float32) * 0.1
  b2 = jax.random.normal(k4, (Cout,), jnp.float32) * 0.1

  x = jax.random.normal(kx, (N, Cin, H, W), jnp.float32)

  out = jax.block_until_ready(jax.jit(out_conv)(x, w1, b1, gamma, beta, w2, b2))
  ref = jax.block_until_ready(jax.jit(reference)(x, w1, b1, gamma, beta, w2, b2))

  assert out.shape == (N, Cout, H, W)
  assert jnp.allclose(out, ref, atol=1e-4, rtol=1e-4), (
      f"max abs err {jnp.max(jnp.abs(out - ref))}")

  print("KERNEL_OK")
</pallas_src>

<mosaic_0001>
module attributes {stable_mosaic.version = 11 : i64} {
  func.func @stats_kernel(%arg0: i32, %arg1: memref<1x8x640xf32, #tpu.memory_space<vmem>>, %arg2: memref<4x72xf32, #tpu.memory_space<vmem>>, %arg3: memref<1x512xf32, #tpu.memory_space<vmem>>, %arg4: memref<1x4x2xf32, #tpu.memory_space<vmem>>, %arg5: memref<72x512xf32, #tpu.memory_space<vmem>>) attributes {dimension_semantics = [#tpu.dimension_semantics<parallel>], iteration_bounds = array<i64: 2>, scalar_prefetch = 0 : i64, scratch_operands = 1 : i64, tpu.core_type = #tpu.core_type<tc>, window_params = [{transform_indices = @transform_0, window_bounds = array<i64: 1, 8, 640>}, {pipeline_mode = #tpu.pipeline_mode<synchronous>, transform_indices = @transform_1, window_bounds = array<i64: 4, 72>}, {transform_indices = @transform_2, window_bounds = array<i64: 1, 512>}, {transform_indices = @transform_3, window_bounds = array<i64: 1, 4, 2>}]} {
    %c0 = arith.constant 0 : index
    %c0_0 = arith.constant 0 : index
    %c0_1 = arith.constant 0 : index
    %0 = vector.load %arg1[%c0, %c0_0, %c0_1] : memref<1x8x640xf32, #tpu.memory_space<vmem>>, vector<1x8x512xf32>
    %1 = vector.shape_cast %0 : vector<1x8x512xf32> to vector<8x512xf32>
    %c0_2 = arith.constant 0 : index
    %c0_3 = arith.constant 0 : index
    %2 = vector.load %arg5[%c0_2, %c0_3] : memref<72x512xf32, #tpu.memory_space<vmem>>, vector<8x512xf32>
    tpu.vector_store %arg5[%c0_2, %c0_3], %1 {strides = array<i32>} : memref<72x512xf32, #tpu.memory_space<vmem>>, vector<8x512xf32>,
    %c0_4 = arith.constant 0 : index
    %c0_5 = arith.constant 0 : index
    %c1 = arith.constant 1 : index
    %3 = vector.load %arg1[%c0_4, %c0_5, %c1] : memref<1x8x640xf32, #tpu.memory_space<vmem>>, vector<1x8x512xf32>
    %4 = vector.shape_cast %3 : vector<1x8x512xf32> to vector<8x512xf32>
    %c8 = arith.constant 8 : index
    %c0_6 = arith.constant 0 : index
    %5 = vector.load %arg5[%c8, %c0_6] : memref<72x512xf32, #tpu.memory_space<vmem>>, vector<8x512xf32>
    tpu.vector_store %arg5[%c8, %c0_6], %4 {strides = array<i32>} : memref<72x512xf32, #tpu.memory_space<vmem>>, vector<8x512xf32>,
    %c0_7 = arith.constant 0 : index
    %c0_8 = arith.constant 0 : index
    %c2 = arith.constant 2 : index
    %6 = vector.load %arg1[%c0_7, %c0_8, %c2] : memref<1x8x640xf32, #tpu.memory_space<vmem>>, vector<1x8x512xf32>
    %7 = vector.shape_cast %6 : vector<1x8x512xf32> to vector<8x512xf32>
    %c16 = arith.constant 16 : index
    %c0_9 = arith.constant 0 : index
    %8 = vector.load %arg5[%c16, %c0_9] : memref<72x512xf32, #tpu.memory_space<vmem>>, vector<8x512xf32>
    tpu.vector_store %arg5[%c16, %c0_9], %7 {strides = array<i32>} : memref<72x512xf32, #tpu.memory_space<vmem>>, vector<8x512xf32>,
    %c0_10 = arith.constant 0 : index
    %c0_11 = arith.constant 0 : index
    %c18 = arith.constant 18 : index
    %9 = vector.load %arg1[%c0_10, %c0_11, %c18] : memref<1x8x640xf32, #tpu.memory_space<vmem>>, vector<1x8x512xf32>
    %10 = vector.shape_cast %9 : vector<1x8x512xf32> to vector<8x512xf32>
    %c24 = arith.constant 24 : index
    %c0_12 = arith.constant 0 : index
    %11 = vector.load %arg5[%c24, %c0_12] : memref<72x512xf32, #tpu.memory_space<vmem>>, vector<8x512xf32>
    tpu.vector_store %arg5[%c24, %c0_12], %10 {strides = array<i32>} : memref<72x512xf32, #tpu.memory_space<vmem>>, vector<8x512xf32>,
    %c0_13 = arith.constant 0 : index
    %c0_14 = arith.constant 0 : index
    %c19 = arith.constant 19 : index
    %12 = vector.load %arg1[%c0_13, %c0_14, %c19] : memref<1x8x640xf32, #tpu.memory_space<vmem>>, vector<1x8x512xf32>
    %13 = vector.shape_cast %12 : vector<1x8x512xf32> to vector<8x512xf32>
    %c32 = arith.constant 32 : index
    %c0_15 = arith.constant 0 : index
    %14 = vector.load %arg5[%c32, %c0_15] : memref<72x512xf32, #tpu.memory_space<vmem>>, vector<8x512xf32>
    tpu.vector_store %arg5[%c32, %c0_15], %13 {strides = array<i32>} : memref<72x512xf32, #tpu.memory_space<vmem>>, vector<8x512xf32>,
    %c0_16 = arith.constant 0 : index
    %c0_17 = arith.constant 0 : index
    %c20 = arith.constant 20 : index
    %15 = vector.load %arg1[%c0_16, %c0_17, %c20] : memref<1x8x640xf32, #tpu.memory_space<vmem>>, vector<1x8x512xf32>
    %16 = vector.shape_cast %15 : vector<1x8x512xf32> to vector<8x512xf32>
    %c40 = arith.constant 40 : index
    %c0_18 = arith.constant 0 : index
    %17 = vector.load %arg5[%c40, %c0_18] : memref<72x512xf32, #tpu.memory_space<vmem>>, vector<8x512xf32>
    tpu.vector_store %arg5[%c40, %c0_18], %16 {strides = array<i32>} : memref<72x512xf32, #tpu.memory_space<vmem>>, vector<8x512xf32>,
    %c0_19 = arith.constant 0 : index
    %c0_20 = arith.constant 0 : index
    %c36 = arith.constant 36 : index
    %18 = vector.load %arg1[%c0_19, %c0_20, %c36] : memref<1x8x640xf32, #tpu.memory_space<vmem>>, vector<1x8x512xf32>
    %19 = vector.shape_cast %18 : vector<1x8x512xf32> to vector<8x512xf32>
    %c48 = arith.constant 48 : index
    %c0_21 = arith.constant 0 : index
    %20 = vector.load %arg5[%c48, %c0_21] : memref<72x512xf32, #tpu.memory_space<vmem>>, vector<8x512xf32>
    tpu.vector_store %arg5[%c48, %c0_21], %19 {strides = array<i32>} : memref<72x512xf32, #tpu.memory_space<vmem>>, vector<8x512xf32>,
    %c0_22 = arith.constant 0 : index
    %c0_23 = arith.constant 0 : index
    %c37 = arith.constant 37 : index
    %21 = vector.load %arg1[%c0_22, %c0_23, %c37] : memref<1x8x640xf32, #tpu.memory_space<vmem>>, vector<1x8x512xf32>
    %22 = vector.shape_cast %21 : vector<1x8x512xf32> to vector<8x512xf32>
    %c56 = arith.constant 56 : index
    %c0_24 = arith.constant 0 : index
    %23 = vector.load %arg5[%c56, %c0_24] : memref<72x512xf32, #tpu.memory_space<vmem>>, vector<8x512xf32>
    tpu.vector_store %arg5[%c56, %c0_24], %22 {strides = array<i32>} : memref<72x512xf32, #tpu.memory_space<vmem>>, vector<8x512xf32>,
    %c0_25 = arith.constant 0 : index
    %c0_26 = arith.constant 0 : index
    %c38 = arith.constant 38 : index
    %24 = vector.load %arg1[%c0_25, %c0_26, %c38] : memref<1x8x640xf32, #tpu.memory_space<vmem>>, vector<1x8x512xf32>
    %25 = vector.shape_cast %24 : vector<1x8x512xf32> to vector<8x512xf32>
    %c64 = arith.constant 64 : index
    %c0_27 = arith.constant 0 : index
    %26 = vector.load %arg5[%c64, %c0_27] : memref<72x512xf32, #tpu.memory_space<vmem>>, vector<8x512xf32>
    tpu.vector_store %arg5[%c64, %c0_27], %25 {strides = array<i32>} : memref<72x512xf32, #tpu.memory_space<vmem>>, vector<8x512xf32>,
    %c0_28 = arith.constant 0 : index
    %c0_29 = arith.constant 0 : index
    %27 = vector.load %arg2[%c0_28, %c0_29] : memref<4x72xf32, #tpu.memory_space<vmem>>, vector<4x72xf32>
    %c0_30 = arith.constant 0 : index
    %c0_31 = arith.constant 0 : index
    %28 = vector.load %arg5[%c0_30, %c0_31] : memref<72x512xf32, #tpu.memory_space<vmem>>, vector<72x512xf32>
    %cst = arith.constant dense<0.000000e+00> : vector<4x512xf32>
    %29 = tpu.matmul %27, %28, %cst {dimension_numbers = #tpu.dot_dimension_numbers<[1], [0], [0], [1], [0, 0, 1, 1], [], []>} : vector<4x72xf32>, vector<72x512xf32>, vector<4x512xf32> -> vector<4x512xf32>
    %c0_32 = arith.constant 0 : index
    %c0_33 = arith.constant 0 : index
    %30 = vector.load %arg3[%c0_32, %c0_33] : memref<1x512xf32, #tpu.memory_space<vmem>>, vector<1x512xf32>
    %31 = vector.broadcast %30 : vector<1x512xf32> to vector<4x512xf32>
    %32 = arith.mulf %29, %31 : vector<4x512xf32>
    %cst_34 = arith.constant dense<0.000000e+00> : vector<4xf32>
    %33 = vector.multi_reduction <add>, %32, %cst_34 [1] : vector<4x512xf32> to vector<4xf32>
    %34 = vector.shape_cast %33 : vector<4xf32> to vector<4x1xf32>
    %c0_35 = arith.constant 0 : index
    %c0_36 = arith.constant 0 : index
    %c0_37 = arith.constant 0 : index
    %35 = vector.load %arg4[%c0_35, %c0_36, %c0_37] : memref<1x4x2xf32, #tpu.memory_space<vmem>>, vector<1x4x1xf32>
    %36 = vector.shape_cast %35 : vector<1x4x1xf32> to vector<4x1xf32>
    %37 = vector.shape_cast %34 : vector<4x1xf32> to vector<1x4x1xf32>
    tpu.vector_store %arg4[%c0_35, %c0_36, %c0_37], %37 {strides = array<i32>} : memref<1x4x2xf32, #tpu.memory_space<vmem>>, vector<1x4x1xf32>,
    %38 = arith.mulf %32, %32 : vector<4x512xf32>
    %cst_38 = arith.constant dense<0.000000e+00> : vector<4xf32>
    %39 = vector.multi_reduction <add>, %38, %cst_38 [1] : vector<4x512xf32> to vector<4xf32>
    %40 = vector.shape_cast %39 : vector<4xf32> to vector<4x1xf32>
    %c0_39 = arith.constant 0 : index
    %c0_40 = arith.constant 0 : index
    %c1_41 = arith.constant 1 : index
    %41 = vector.load %arg4[%c0_39, %c0_40, %c1_41] : memref<1x4x2xf32, #tpu.memory_space<vmem>>, vector<1x4x1xf32>
    %42 = vector.shape_cast %41 : vector<1x4x1xf32> to vector<4x1xf32>
    %43 = vector.shape_cast %40 : vector<4x1xf32> to vector<1x4x1xf32>
    tpu.vector_store %arg4[%c0_39, %c0_40, %c1_41], %43 {strides = array<i32>} : memref<1x4x2xf32, #tpu.memory_space<vmem>>, vector<1x4x1xf32>,
    return
  }
  func.func @transform_0(%arg0: i32) -> (i32, i32, i32) {
    %c0_i32 = arith.constant 0 : i32
    %c0_i32_0 = arith.constant 0 : i32
    %c0_i32_1 = arith.constant 0 : i32
    return %arg0, %c0_i32, %c0_i32_0 : i32, i32, i32
  }
  func.func @transform_1(%arg0: i32) -> (i32, i32) {
    %c0_i32 = arith.constant 0 : i32
    %c0_i32_0 = arith.constant 0 : i32
    %c0_i32_1 = arith.constant 0 : i32
    return %c0_i32, %c0_i32_0 : i32, i32
  }
  func.func @transform_2(%arg0: i32) -> (i32, i32) {
    %c0_i32 = arith.constant 0 : i32
    %c0_i32_0 = arith.constant 0 : i32
    return %c0_i32, %arg0 : i32, i32
  }
  func.func @transform_3(%arg0: i32) -> (i32, i32, i32) {
    %c0_i32 = arith.constant 0 : i32
    %c0_i32_0 = arith.constant 0 : i32
    %c0_i32_1 = arith.constant 0 : i32
    return %arg0, %c0_i32, %c0_i32_0 : i32, i32, i32
  }
}

module attributes {stable_mosaic.version = 11 : i64} {
  func.func @apply_kernel(%arg0: i32, %arg1: memref<1x8x640xf32, #tpu.memory_space<vmem>>, %arg2: memref<4x72xf32, #tpu.memory_space<vmem>>, %arg3: memref<4x1xf32, #tpu.memory_space<vmem>>, %arg4: memref<3x4xf32, #tpu.memory_space<vmem>>, %arg5: memref<3x1xf32, #tpu.memory_space<vmem>>, %arg6: memref<3x512xf32, #tpu.memory_space<vmem>>, %arg7: memref<72x512xf32, #tpu.memory_space<vmem>>) attributes {dimension_semantics = [#tpu.dimension_semantics<parallel>], iteration_bounds = array<i64: 2>, scalar_prefetch = 0 : i64, scratch_operands = 1 : i64, tpu.core_type = #tpu.core_type<tc>, window_params = [{transform_indices = @transform_0, window_bounds = array<i64: 1, 8, 640>}, {pipeline_mode = #tpu.pipeline_mode<synchronous>, transform_indices = @transform_1, window_bounds = array<i64: 4, 72>}, {pipeline_mode = #tpu.pipeline_mode<synchronous>, transform_indices = @transform_2, window_bounds = array<i64: 4, 1>}, {pipeline_mode = #tpu.pipeline_mode<synchronous>, transform_indices = @transform_3, window_bounds = array<i64: 3, 4>}, {pipeline_mode = #tpu.pipeline_mode<synchronous>, transform_indices = @transform_4, window_bounds = array<i64: 3, 1>}, {transform_indices = @transform_5, window_bounds = array<i64: 3, 512>}]} {
    %c0 = arith.constant 0 : index
    %c0_0 = arith.constant 0 : index
    %c0_1 = arith.constant 0 : index
    %0 = vector.load %arg1[%c0, %c0_0, %c0_1] : memref<1x8x640xf32, #tpu.memory_space<vmem>>, vector<1x8x512xf32>
    %1 = vector.shape_cast %0 : vector<1x8x512xf32> to vector<8x512xf32>
    %c0_2 = arith.constant 0 : index
    %c0_3 = arith.constant 0 : index
    %2 = vector.load %arg7[%c0_2, %c0_3] : memref<72x512xf32, #tpu.memory_space<vmem>>, vector<8x512xf32>
    tpu.vector_store %arg7[%c0_2, %c0_3], %1 {strides = array<i32>} : memref<72x512xf32, #tpu.memory_space<vmem>>, vector<8x512xf32>,
    %c0_4 = arith.constant 0 : index
    %c0_5 = arith.constant 0 : index
    %c1 = arith.constant 1 : index
    %3 = vector.load %arg1[%c0_4, %c0_5, %c1] : memref<1x8x640xf32, #tpu.memory_space<vmem>>, vector<1x8x512xf32>
    %4 = vector.shape_cast %3 : vector<1x8x512xf32> to vector<8x512xf32>
    %c8 = arith.constant 8 : index
    %c0_6 = arith.constant 0 : index
    %5 = vector.load %arg7[%c8, %c0_6] : memref<72x512xf32, #tpu.memory_space<vmem>>, vector<8x512xf32>
    tpu.vector_store %arg7[%c8, %c0_6], %4 {strides = array<i32>} : memref<72x512xf32, #tpu.memory_space<vmem>>, vector<8x512xf32>,
    %c0_7 = arith.constant 0 : index
    %c0_8 = arith.constant 0 : index
    %c2 = arith.constant 2 : index
    %6 = vector.load %arg1[%c0_7, %c0_8, %c2] : memref<1x8x640xf32, #tpu.memory_space<vmem>>, vector<1x8x512xf32>
    %7 = vector.shape_cast %6 : vector<1x8x512xf32> to vector<8x512xf32>
    %c16 = arith.constant 16 : index
    %c0_9 = arith.constant 0 : index
    %8 = vector.load %arg7[%c16, %c0_9] : memref<72x512xf32, #tpu.memory_space<vmem>>, vector<8x512xf32>
    tpu.vector_store %arg7[%c16, %c0_9], %7 {strides = array<i32>} : memref<72x512xf32, #tpu.memory_space<vmem>>, vector<8x512xf32>,
    %c0_10 = arith.constant 0 : index
    %c0_11 = arith.constant 0 : index
    %c18 = arith.constant 18 : index
    %9 = vector.load %arg1[%c0_10, %c0_11, %c18] : memref<1x8x640xf32, #tpu.memory_space<vmem>>, vector<1x8x512xf32>
    %10 = vector.shape_cast %9 : vector<1x8x512xf32> to vector<8x512xf32>
    %c24 = arith.constant 24 : index
    %c0_12 = arith.constant 0 : index
    %11 = vector.load %arg7[%c24, %c0_12] : memref<72x512xf32, #tpu.memory_space<vmem>>, vector<8x512xf32>
    tpu.vector_store %arg7[%c24, %c0_12], %10 {strides = array<i32>} : memref<72x512xf32, #tpu.memory_space<vmem>>, vector<8x512xf32>,
    %c0_13 = arith.constant 0 : index
    %c0_14 = arith.constant 0 : index
    %c19 = arith.constant 19 : index
    %12 = vector.load %arg1[%c0_13, %c0_14, %c19] : memref<1x8x640xf32, #tpu.memory_space<vmem>>, vector<1x8x512xf32>
    %13 = vector.shape_cast %12 : vector<1x8x512xf32> to vector<8x512xf32>
    %c32 = arith.constant 32 : index
    %c0_15 = arith.constant 0 : index
    %14 = vector.load %arg7[%c32, %c0_15] : memref<72x512xf32, #tpu.memory_space<vmem>>, vector<8x512xf32>
    tpu.vector_store %arg7[%c32, %c0_15], %13 {strides = array<i32>} : memref<72x512xf32, #tpu.memory_space<vmem>>, vector<8x512xf32>,
    %c0_16 = arith.constant 0 : index
    %c0_17 = arith.constant 0 : index
    %c20 = arith.constant 20 : index
    %15 = vector.load %arg1[%c0_16, %c0_17, %c20] : memref<1x8x640xf32, #tpu.memory_space<vmem>>, vector<1x8x512xf32>
    %16 = vector.shape_cast %15 : vector<1x8x512xf32> to vector<8x512xf32>
    %c40 = arith.constant 40 : index
    %c0_18 = arith.constant 0 : index
    %17 = vector.load %arg7[%c40, %c0_18] : memref<72x512xf32, #tpu.memory_space<vmem>>, vector<8x512xf32>
    tpu.vector_store %arg7[%c40, %c0_18], %16 {strides = array<i32>} : memref<72x512xf32, #tpu.memory_space<vmem>>, vector<8x512xf32>,
    %c0_19 = arith.constant 0 : index
    %c0_20 = arith.constant 0 : index
    %c36 = arith.constant 36 : index
    %18 = vector.load %arg1[%c0_19, %c0_20, %c36] : memref<1x8x640xf32, #tpu.memory_space<vmem>>, vector<1x8x512xf32>
    %19 = vector.shape_cast %18 : vector<1x8x512xf32> to vector<8x512xf32>
    %c48 = arith.constant 48 : index
    %c0_21 = arith.constant 0 : index
    %20 = vector.load %arg7[%c48, %c0_21] : memref<72x512xf32, #tpu.memory_space<vmem>>, vector<8x512xf32>
    tpu.vector_store %arg7[%c48, %c0_21], %19 {strides = array<i32>} : memref<72x512xf32, #tpu.memory_space<vmem>>, vector<8x512xf32>,
    %c0_22 = arith.constant 0 : index
    %c0_23 = arith.constant 0 : index
    %c37 = arith.constant 37 : index
    %21 = vector.load %arg1[%c0_22, %c0_23, %c37] : memref<1x8x640xf32, #tpu.memory_space<vmem>>, vector<1x8x512xf32>
    %22 = vector.shape_cast %21 : vector<1x8x512xf32> to vector<8x512xf32>
    %c56 = arith.constant 56 : index
    %c0_24 = arith.constant 0 : index
    %23 = vector.load %arg7[%c56, %c0_24] : memref<72x512xf32, #tpu.memory_space<vmem>>, vector<8x512xf32>
    tpu.vector_store %arg7[%c56, %c0_24], %22 {strides = array<i32>} : memref<72x512xf32, #tpu.memory_space<vmem>>, vector<8x512xf32>,
    %c0_25 = arith.constant 0 : index
    %c0_26 = arith.constant 0 : index
    %c38 = arith.constant 38 : index
    %24 = vector.load %arg1[%c0_25, %c0_26, %c38] : memref<1x8x640xf32, #tpu.memory_space<vmem>>, vector<1x8x512xf32>
    %25 = vector.shape_cast %24 : vector<1x8x512xf32> to vector<8x512xf32>
    %c64 = arith.constant 64 : index
    %c0_27 = arith.constant 0 : index
    %26 = vector.load %arg7[%c64, %c0_27] : memref<72x512xf32, #tpu.memory_space<vmem>>, vector<8x512xf32>
    tpu.vector_store %arg7[%c64, %c0_27], %25 {strides = array<i32>} : memref<72x512xf32, #tpu.memory_space<vmem>>, vector<8x512xf32>,
    %c0_28 = arith.constant 0 : index
    %c0_29 = arith.constant 0 : index
    %27 = vector.load %arg2[%c0_28, %c0_29] : memref<4x72xf32, #tpu.memory_space<vmem>>, vector<4x72xf32>
    %c0_30 = arith.constant 0 : index
    %c0_31 = arith.constant 0 : index
    %28 = vector.load %arg7[%c0_30, %c0_31] : memref<72x512xf32, #tpu.memory_space<vmem>>, vector<72x512xf32>
    %cst = arith.constant dense<0.000000e+00> : vector<4x512xf32>
    %29 = tpu.matmul %27, %28, %cst {dimension_numbers = #tpu.dot_dimension_numbers<[1], [0], [0], [1], [0, 0, 1, 1], [], []>} : vector<4x72xf32>, vector<72x512xf32>, vector<4x512xf32> -> vector<4x512xf32>
    %c0_32 = arith.constant 0 : index
    %c0_33 = arith.constant 0 : index
    %30 = vector.load %arg3[%c0_32, %c0_33] : memref<4x1xf32, #tpu.memory_space<vmem>>, vector<4x1xf32>
    %31 = vector.broadcast %30 : vector<4x1xf32> to vector<4x512xf32>
    %32 = arith.addf %29, %31 : vector<4x512xf32>
    %cst_34 = arith.constant 0.000000e+00 : f32
    %33 = vector.broadcast %cst_34 : f32 to vector<4x512xf32>
    %34 = arith.maximumf %32, %33 : vector<4x512xf32>
    %c0_35 = arith.constant 0 : index
    %c0_36 = arith.constant 0 : index
    %35 = vector.load %arg4[%c0_35, %c0_36] : memref<3x4xf32, #tpu.memory_space<vmem>>, vector<3x4xf32>
    %cst_37 = arith.constant dense<0.000000e+00> : vector<3x512xf32>
    %36 = tpu.matmul %35, %34, %cst_37 {dimension_numbers = #tpu.dot_dimension_numbers<[1], [0], [0], [1], [0, 0, 1, 1], [], []>} : vector<3x4xf32>, vector<4x512xf32>, vector<3x512xf32> -> vector<3x512xf32>
    %c0_38 = arith.constant 0 : index
    %c0_39 = arith.constant 0 : index
    %37 = vector.load %arg5[%c0_38, %c0_39] : memref<3x1xf32, #tpu.memory_space<vmem>>, vector<3x1xf32>
    %38 = vector.broadcast %37 : vector<3x1xf32> to vector<3x512xf32>
    %39 = arith.addf %36, %38 : vector<3x512xf32>
    %40 = arith.negf %39 : vector<3x512xf32>
    %41 = math.exp %40 : vector<3x512xf32>
    %cst_40 = arith.constant 1.000000e+00 : f32
    %42 = vector.broadcast %cst_40 : f32 to vector<3x512xf32>
    %43 = arith.addf %42, %41 : vector<3x512xf32>
    %44 = arith.divf %42, %43 : vector<3x512xf32>
    %c0_41 = arith.constant 0 : index
    %c0_42 = arith.constant 0 : index
    %45 = vector.load %arg6[%c0_41, %c0_42] : memref<3x512xf32, #tpu.memory_space<vmem>>, vector<3x512xf32>
    tpu.vector_store %arg6[%c0_41, %c0_42], %44 {strides = array<i32>} : memref<3x512xf32, #tpu.memory_space<vmem>>, vector<3x512xf32>,
    return
  }
  func.func @transform_0(%arg0: i32) -> (i32, i32, i32) {
    %c0_i32 = arith.constant 0 : i32
    %c0_i32_0 = arith.constant 0 : i32
    %c0_i32_1 = arith.constant 0 : i32
    return %arg0, %c0_i32, %c0_i32_0 : i32, i32, i32
  }
  func.func @transform_1(%arg0: i32) -> (i32, i32) {
    %c0_i32 = arith.constant 0 : i32
    %c0_i32_0 = arith.constant 0 : i32
    %c0_i32_1 = arith.constant 0 : i32
    return %c0_i32, %c0_i32_0 : i32, i32
  }
  func.func @transform_2(%arg0: i32) -> (i32, i32) {
    %c0_i32 = arith.constant 0 : i32
    %c0_i32_0 = arith.constant 0 : i32
    %c0_i32_1 = arith.constant 0 : i32
    return %c0_i32, %c0_i32_0 : i32, i32
  }
  func.func @transform_3(%arg0: i32) -> (i32, i32) {
    %c0_i32 = arith.constant 0 : i32
    %c0_i32_0 = arith.constant 0 : i32
    %c0_i32_1 = arith.constant 0 : i32
    return %c0_i32, %c0_i32_0 : i32, i32
  }
  func.func @transform_4(%arg0: i32) -> (i32, i32) {
    %c0_i32 = arith.constant 0 : i32
    %c0_i32_0 = arith.constant 0 : i32
    %c0_i32_1 = arith.constant 0 : i32
    return %c0_i32, %c0_i32_0 : i32, i32
  }
  func.func @transform_5(%arg0: i32) -> (i32, i32) {
    %c0_i32 = arith.constant 0 : i32
    %c0_i32_0 = arith.constant 0 : i32
    return %c0_i32, %arg0 : i32, i32
  }
}

</mosaic_0001>

<bundles_post_ra>
// kernel: out_conv.2
= control target key start
LH: loop header
LB: loop body
LE: loop exit
PB: predicated region body
PF: predicated region fallthrough
CT: control target
= control target key end

     0   :  { %s825_s12 = smov 0   ;;  %s943_s0 = inlined_call_operand.vmem [shape: f32[2,8,640], index: 0, kind: input, shape index: {}]   ;;  %s944_s1 = inlined_call_operand.vmem [shape: f32[4,72], index: 1, kind: input, shape index: {}]   ;;  %s945_s2 = inlined_call_operand.vmem [shape: f32[1,1024], index: 2, kind: input, shape index: {}]   ;;  %s946_s3 = inlined_call_operand.vmem [shape: f32[2,4,2], index: 3, kind: output, shape index: {}]  }
   0x1 LB: > { %s831_s13 = sadd.s32 4294967295, %s794_s12   ;;  %p762_p0 = scmp.ge.s32.totalorder %s794_s12, 1  ;;  %s794_s12 = sphi %s825_s12, %s13_s12  }
   0x2   : > { %p147_p1 = scmp.lt.s32.totalorder %s794_s12, 3 }
   0x4   : > { %p148_p2 = pnand %p762_p0, %p147_p1 }
   0x5   : > { %p174_p3 = scmp.lt.s32.totalorder (!%p148_p2), %s831_s13, 1  ;;  %s796_s19 = smov (!%p148_p2), 90  }
   0x6   : > { %151 = sbr.rel (%p148_p2) target bundleno = 554 (0x22a), region = 32  ;;  %s797_s20 = smov (!%p148_p2), 91  }
   0x7   : > { %s798_s21 = smov (!%p148_p2), 92   ;;  %s799_s22 = smov (!%p148_p2), 108  }
   0x8   : > { %s800_s23 = smov (!%p148_p2), 109   ;;  %s801_s24 = smov (!%p148_p2), 110  }
   0x9   : > { %s802_s25 = smov (!%p148_p2), 126   ;;  %s803_s26 = smov (!%p148_p2), 127  }
   0xa   : > { %s764_s29 = sshll.u32 (!%p148_p2), %s831_s13, 2 }
   0xb   : > { %s837_s14 = scalar_select %p174_p3, %s831_s13, 1  ;;  %v804_v5 = vmov 0.0   ;;  %vm447_vm0 = vcmask 736256   ;;  %vm414_vm1 = vcmask 744448   ;;  %vm381_vm2 = vcmask 752640  }
   0xc   : > { %565 = vmatprep.mubr.f32.mxu0 %v804_v5  ;;  %636 = vmatprep.mubr.f32.mxu1 %v804_v5  ;;  %vm348_vm3 = vcmask 883712   ;;  %vm315_vm4 = vcmask 891904   ;;  %vm282_vm5 = vcmask 900096   ;;  %vm249_vm6 = vcmask 1031168   ;;  %p180_p4 = scmp.lt.s32.totalorder %s764_s29, 7 }
   0xd   : > { %s770_s15 = smul.u32 40, %s837_s14  ;;  %vm216_vm7 = vcmask 1039360   ;;  %vm497_vm8 = vcmask 588800   ;;  %vm669_vm9 = vcmask 1043456   ;;  %s765_s6 = sshll.u32 %s837_s14, 2  ;;  %vm679_vm10 = vcmask 3072  }
   0xe   : > { %s948_s29 = smov (!%p180_p4, %s764_s29), 7  ;;  %s187_s9 = scalar_lea.vmem %s946_s3, %s765_s6  ;;  %vm694_vm11 = vcmask 11272  }
   0xf   : > { %s178_s18 = scalar_lea.vmem %s943_s0, %s770_s15  ;;  %s182_s5 = scalar_lea.vmem %s945_s2, %s948_s29 }
  0x10   : > { %v843_v0 = vld [vmem:[%s178_s18 + $0x8] sm:$0xff]  ;;  %v845_v1 = vld [vmem:[%s178_s18] sm:$0xff]  ;;  %v849_v2 = vld [vmem:[%s178_s18 + $0x10] sm:$0xff] }
  0x11   : > { %439 = vrot.lane.b32.xlu0 %v843_v0, %s796_s19  ;;  %437 = vrot.lane.b32.xlu1 %v845_v1, %s796_s19  ;;  %v431_v3 = vld [vmem:[%s178_s18 + $0x20] sm:$0xff]  ;;  %v857_v4 = vld [vmem:[%s178_s18 + $0x18] sm:$0xff] }
  0x15   : > { %441 = vrot.lane.b32.xlu0 %v849_v2, %s796_s19  ;;  %406 = vrot.lane.b32.xlu1 %v843_v0, %s797_s20 }
  0x19   : > { %408 = vrot.lane.b32.xlu0 %v849_v2, %s797_s20  ;;  %404 = vrot.lane.b32.xlu1 %v845_v1, %s797_s20 }
  0x1d   : > { %375 = vrot.lane.b32.xlu1 %v849_v2, %s798_s21  ;;  %373 = vrot.lane.b32.xlu0 %v843_v0, %s798_s21 }
  0x21   : > { %445 = vrot.lane.b32.xlu1 %v431_v3, %s796_s19  ;;  %443 = vrot.lane.b32.xlu0 %v857_v4, %s796_s19 }
  0x25   : > { %371 = vrot.lane.b32.xlu0 %v845_v1, %s798_s21  ;;  %340 = vrot.lane.b32.xlu1 %v843_v0, %s799_s22 }
  0x29   : > { %342 = vrot.lane.b32.xlu0 %v849_v2, %s799_s22  ;;  %410 = vrot.lane.b32.xlu1 %v857_v4, %s797_s20 }
  0x2d   : > { %412 = vrot.lane.b32.xlu0 %v431_v3, %s797_s20  ;;  %338 = vrot.lane.b32.xlu1 %v845_v1, %s799_s22 }
  0x31   : > { %309 = vrot.lane.b32.xlu1 %v849_v2, %s800_s23  ;;  %307 = vrot.lane.b32.xlu0 %v843_v0, %s800_s23 }
  0x35   : > { %379 = vrot.lane.b32.xlu1 %v431_v3, %s798_s21  ;;  %377 = vrot.lane.b32.xlu0 %v857_v4, %s798_s21 }
  0x39   : > { %305 = vrot.lane.b32.xlu0 %v845_v1, %s800_s23  ;;  %274 = vrot.lane.b32.xlu1 %v843_v0, %s801_s24 }
  0x3d   : > { %276 = vrot.lane.b32.xlu0 %v849_v2, %s801_s24  ;;  %344 = vrot.lane.b32.xlu1 %v857_v4, %s799_s22 }
  0x41   : > { %346 = vrot.lane.b32.xlu0 %v431_v3, %s799_s22  ;;  %272 = vrot.lane.b32.xlu1 %v845_v1, %s801_s24 }
  0x45   : > { %243 = vrot.lane.b32.xlu1 %v849_v2, %s802_s25  ;;  %241 = vrot.lane.b32.xlu0 %v843_v0, %s802_s25 }
  0x49   : > { %313 = vrot.lane.b32.xlu1 %v431_v3, %s800_s23  ;;  %311 = vrot.lane.b32.xlu0 %v857_v4, %s800_s23 }
  0x4d   : > { %239 = vrot.lane.b32.xlu0 %v845_v1, %s802_s25  ;;  %208 = vrot.lane.b32.xlu1 %v843_v0, %s803_s26 }
  0x51   : > { %210 = vrot.lane.b32.xlu0 %v849_v2, %s803_s26  ;;  %278 = vrot.lane.b32.xlu1 %v857_v4, %s801_s24 }
  0x55   : > { %280 = vrot.lane.b32.xlu0 %v431_v3, %s801_s24  ;;  %206 = vrot.lane.b32.xlu1 %v845_v1, %s803_s26 }
  0x59   : > { %245 = vrot.lane.b32.xlu0 %v857_v4, %s802_s25  ;;  %247 = vrot.lane.b32.xlu1 %v431_v3, %s802_s25 }
  0x5d   : > { %212 = vrot.lane.b32.xlu0 %v857_v4, %s803_s26  ;;  %214 = vrot.lane.b32.xlu1 %v431_v3, %s803_s26 }
  0x83   : > { %v440_v6 = vpop.permute.xlu0 %439  ;;  %v438_v7 = vpop.permute.xlu1 %437 }
  0x84   : > { %v448_v11 = vsel %vm447_vm0, %v438_v7, %v440_v6 }
  0x87   : > { %v442_v8 = vpop.permute.xlu0 %441  ;;  %v407_v9 = vpop.permute.xlu1 %406 }
  0x88   : > { %v449_v10 = vsel %vm447_vm0, %v440_v6, %v442_v8 }
  0x89   : > { %515 = vmatprep.subr.mxu0 %v449_v10  ;;  %v460_v10 = vld [vmem:[%s944_s1] sm:$0xf] }
  0x8a   : > { %516 = vmatpush1.msra.mxu0 %v448_v11 }
  0x8b   : > { %v409_v12 = vpop.permute.xlu0 %408  ;;  %v405_v13 = vpop.permute.xlu1 %404 }
  0x8c   : > { %v416_v14 = vsel %vm414_vm1, %v407_v9, %v409_v12  ;;  %v415_v15 = vsel %vm414_vm1, %v405_v13, %v407_v9 }
  0x8d   : > { %517 = vmatprep.subr.mxu0 %v416_v14 }
  0x8e   : > { %518 = vmatpush1.msra.mxu0 %v415_v15 }
  0x8f   : > { %v376_v16 = vpop.permute.xlu1 %375  ;;  %v374_v17 = vpop.permute.xlu0 %373 }
  0x90   : > { %v383_v18 = vsel %vm381_vm2, %v374_v17, %v376_v16 }
  0x91   : > { %519 = vmatprep.subr.mxu0 %v383_v18 }
  0x93   : > { %v446_v19 = vpop.permute.xlu1 %445  ;;  %v444_v20 = vpop.permute.xlu0 %443 }
  0x94   : > { %v451_v21 = vsel %vm447_vm0, %v444_v20, %v446_v19  ;;  %v450_v22 = vsel %vm447_vm0, %v442_v8, %v444_v20  ;;  %v643_v20 = vld [vmem:[%s182_s5] sm:$0xf] }
  0x95   : > { %586 = vmatprep.subr.mxu1 %v451_v21 }
  0x96   : > { %587 = vmatpush1.msra.mxu1 %v450_v22 }
  0x97   : > { %v372_v23 = vpop.permute.xlu0 %371  ;;  %v341_v24 = vpop.permute.xlu1 %340 }
  0x98   : > { %v382_v25 = vsel %vm381_vm2, %v372_v23, %v374_v17 }
  0x99   : > { %520 = vmatpush1.msra.mxu0 %v382_v25 }
  0x9b   : > { %v343_v26 = vpop.permute.xlu0 %342  ;;  %v411_v27 = vpop.permute.xlu1 %410 }
  0x9c   : > { %v350_v28 = vsel %vm348_vm3, %v341_v24, %v343_v26  ;;  %v417_v33 = vsel %vm414_vm1, %v409_v12, %v411_v27 }
  0x9d   : > { %521 = vmatprep.subr.mxu0 %v350_v28 }
  0x9f   : > { %v413_v29 = vpop.permute.xlu0 %412  ;;  %v339_v30 = vpop.permute.xlu1 %338 }
  0xa0   : > { %v349_v31 = vsel %vm348_vm3, %v339_v30, %v341_v24  ;;  %v418_v32 = vsel %vm414_vm1, %v411_v27, %v413_v29 }
  0xa1   : > { %522 = vmatpush1.msra.mxu0 %v349_v31  ;;  %588 = vmatprep.subr.mxu1 %v418_v32 }
  0xa2   : > { %589 = vmatpush1.msra.mxu1 %v417_v33 }
  0xa3   : > { %v310_v34 = vpop.permute.xlu1 %309  ;;  %v308_v35 = vpop.permute.xlu0 %307 }
  0xa4   : > { %v317_v36 = vsel %vm315_vm4, %v308_v35, %v310_v34 }
  0xa5   : > { %523 = vmatprep.subr.mxu0 %v317_v36 }
  0xa7   : > { %v380_v37 = vpop.permute.xlu1 %379  ;;  %v378_v38 = vpop.permute.xlu0 %377 }
  0xa8   : > { %v385_v39 = vsel %vm381_vm2, %v378_v38, %v380_v37  ;;  %v384_v40 = vsel %vm381_vm2, %v376_v16, %v378_v38 }
  0xa9   : > { %590 = vmatprep.subr.mxu1 %v385_v39 }
  0xaa   : > { %591 = vmatpush1.msra.mxu1 %v384_v40 }
  0xab   : > { %v306_v41 = vpop.permute.xlu0 %305  ;;  %v275_v42 = vpop.permute.xlu1 %274 }
  0xac   : > { %v316_v43 = vsel %vm315_vm4, %v306_v41, %v308_v35 }
  0xad   : > { %524 = vmatpush1.msra.mxu0 %v316_v43 }
  0xaf   : > { %v277_v44 = vpop.permute.xlu0 %276  ;;  %v345_v45 = vpop.permute.xlu1 %344 }
  0xb0   : > { %v284_v46 = vsel %vm282_vm5, %v275_v42, %v277_v44  ;;  %v351_v51 = vsel %vm348_vm3, %v343_v26, %v345_v45 }
  0xb1   : > { %525 = vmatprep.subr.mxu0 %v284_v46 }
  0xb3   : > { %v347_v47 = vpop.permute.xlu0 %346  ;;  %v273_v48 = vpop.permute.xlu1 %272 }
  0xb4   : > { %v283_v49 = vsel %vm282_vm5, %v273_v48, %v275_v42  ;;  %v352_v50 = vsel %vm348_vm3, %v345_v45, %v347_v47 }
  0xb5   : > { %526 = vmatpush1.msra.mxu0 %v283_v49  ;;  %592 = vmatprep.subr.mxu1 %v352_v50 }
  0xb6   : > { %593 = vmatpush1.msra.mxu1 %v351_v51 }
  0xb7   : > { %v244_v52 = vpop.permute.xlu1 %243  ;;  %v242_v53 = vpop.permute.xlu0 %241 }
  0xb8   : > { %v251_v54 = vsel %vm249_vm6, %v242_v53, %v244_v52 }
  0xb9   : > { %527 = vmatprep.subr.mxu0 %v251_v54 }
  0xbb   : > { %v314_v55 = vpop.permute.xlu1 %313  ;;  %v312_v56 = vpop.permute.xlu0 %311 }
  0xbc   : > { %v319_v57 = vsel %vm315_vm4, %v312_v56, %v314_v55  ;;  %v318_v58 = vsel %vm315_vm4, %v310_v34, %v312_v56 }
  0xbd   : > { %594 = vmatprep.subr.mxu1 %v319_v57 }
  0xbe   : > { %595 = vmatpush1.msra.mxu1 %v318_v58 }
  0xbf   : > { %v240_v59 = vpop.permute.xlu0 %239  ;;  %v209_v60 = vpop.permute.xlu1 %208 }
  0xc0   : > { %v250_v61 = vsel %vm249_vm6, %v240_v59, %v242_v53 }
  0xc1   : > { %528 = vmatpush1.msra.mxu0 %v250_v61 }
  0xc3   : > { %v211_v62 = vpop.permute.xlu0 %210  ;;  %v279_v63 = vpop.permute.xlu1 %278 }
  0xc4   : > { %v218_v3 = vsel %vm216_vm7, %v209_v60, %v211_v62  ;;  %v285_v9 = vsel %vm282_vm5, %v277_v44, %v279_v63 }
  0xc5   : > { %529 = vmatprep.subr.mxu0 %v218_v3 }
  0xc7   : > { %v281_v5 = vpop.permute.xlu0 %280  ;;  %v207_v6 = vpop.permute.xlu1 %206 }
  0xc8   : > { %v217_v7 = vsel %vm216_vm7, %v207_v6, %v209_v60  ;;  %v286_v8 = vsel %vm282_vm5, %v279_v63, %v281_v5 }
  0xc9   : > { %530 = vmatpush1.msra.mxu0 %v217_v7  ;;  %596 = vmatprep.subr.mxu1 %v286_v8 }
  0xca   : > { %597 = vmatpush1.msra.mxu1 %v285_v9  ;;  %531 = vmatprep.subr.mxu0 %v843_v0  ;;  %v645_v0 = vlaneseq }
  0xcb   : > { %v246_v11 = vpop.permute.xlu0 %245  ;;  %v248_v12 = vpop.permute.xlu1 %247  ;;  %532 = vmatpush1.msra.mxu0 %v845_v1 }
  0xcc   : > { %v253_v13 = vsel %vm249_vm6, %v246_v11, %v248_v12  ;;  %v252_v14 = vsel %vm249_vm6, %v244_v52, %v246_v11  ;;  %766 = vmatmul.mubr.msk.f32.vlgmr.msra.gmra.mxu0 %vm497_vm8, %v460_v10  ;;  %v646_v1 = vshrl.u32 %v645_v0, 7 }
  0xcd   : > { %598 = vmatprep.subr.mxu1 %v253_v13 }
  0xce   : > { %599 = vmatpush1.msra.mxu1 %v252_v14  ;;  %v647_v19 = vsub.s32 0, %v646_v1  ;;  %v651_v21 = vsub.s32 1, %v646_v1  ;;  %v659_v27 = vsub.s32 3, %v646_v1 }
  0xcf   : > { %v213_v15 = vpop.permute.xlu0 %212  ;;  %v215_v16 = vpop.permute.xlu1 %214 }
  0xd0   : > { %v220_v17 = vsel %vm216_vm7, %v213_v15, %v215_v16  ;;  %v219_v18 = vsel %vm216_vm7, %v211_v62, %v213_v15  ;;  %v648_v22 = vrot.slane %v643_v20, %v647_v19  ;;  %v652_v23 = vrot.slane %v643_v20, %v651_v21 }
  0xd1   : > { %600 = vmatprep.subr.mxu1 %v220_v17  ;;  %v660_v33 = vrot.slane %v643_v20, %v659_v27 }
  0xd2   : > { %601 = vmatpush1.msra.mxu1 %v219_v18 }
  0xd3   : > { %602 = vmatprep.subr.mxu1 %v857_v4 }
  0xd4   : > { %603 = vmatpush1.msra.mxu1 %v849_v2  ;;  %v655_v2 = vsub.s32 2, %v646_v1 }
  0xd5   : > { %767 = vmatmul.mubr.msk.f32.vlgmr.msra.gmra.mxu1 %vm497_vm8, %v460_v10 }
  0xd6   : > { %v656_v30 = vrot.slane %v643_v20, %v655_v2 }
 0x18c   : > { %v567_v24 = vpop.f32.mrf.mxu0 }
 0x18d   : > { %v665_v4 = vmul.f32 %v648_v22, %v567_v24 }
 0x18e   : > { %v569_v25 = vpop.f32.mrf.mxu0 }
 0x18f   : > { %v666_v26 = vmul.f32 %v652_v23, %v569_v25  ;;  %v681_v28 = vmul.f32 %v665_v4, %v665_v4  ;;  %v670_v31 = vsel %vm669_vm9, %v665_v4, 0.0 }
 0x191   : > { %v682_v29 = vmul.f32 %v666_v26, %v666_v26  ;;  %v671_v32 = vsel %vm669_vm9, %v666_v26, 0.0  ;;  %v685_v35 = vsel %vm669_vm9, %v681_v28, 0.0 }
 0x192   : > { %v672_v38 = vadd.f32 %v671_v32, %v670_v31 }
 0x193   : > { %v686_v36 = vsel %vm669_vm9, %v682_v29, 0.0 }
 0x194   : > { %v687_v44 = vadd.f32 %v686_v36, %v685_v35 }
 0x195   : > { %v638_v34 = vpop.f32.mrf.mxu1 }
 0x196   : > { %v667_v37 = vmul.f32 %v656_v30, %v638_v34 }
 0x197   : > { %v640_v39 = vpop.f32.mrf.mxu1 }
 0x198   : > { %v673_v40 = vsel %vm669_vm9, %v667_v37, 0.0  ;;  %v683_v41 = vmul.f32 %v667_v37, %v667_v37  ;;  %v668_v42 = vmul.f32 %v660_v33, %v640_v39 }
 0x199   : > { %v674_v43 = vadd.f32 %v673_v40, %v672_v38 }
 0x19a   : > { %v684_v45 = vmul.f32 %v668_v42, %v668_v42  ;;  %v675_v46 = vsel %vm669_vm9, %v668_v42, 0.0  ;;  %v688_v47 = vsel %vm669_vm9, %v683_v41, 0.0 }
 0x19b   : > { %v676_v48 = vadd.f32 %v675_v46, %v674_v43  ;;  %v689_v49 = vadd.f32 %v688_v47, %v687_v44 }
 0x19c   : > { %v690_v50 = vsel %vm669_vm9, %v684_v45, 0.0 }
 0x19d   : > { %677 = vadd.xlane.f32.xlu0 %v676_v48  ;;  %v691_v51 = vadd.f32 %v690_v50, %v689_v49 }
 0x19f   : > { %692 = vadd.xlane.f32.xlu1 %v691_v51 }
 0x226   : > { %v678_v52 = vpop.xlane.xlu0 %677 }
 0x227   : > { %680 = vst.msk [vmem:[%s187_s9] sm:$0xf] %vm679_vm10, %v678_v52 }
 0x228   : > { %v693_v53 = vpop.xlane.xlu1 %692 }
 0x229   : > { %695 = vst.msk [vmem:[%s187_s9] sm:$0xf] %vm694_vm11, %v693_v53 }
 0x22a PF: > { %s13_s12 = sadd.s32 1, %s794_s12  }
 0x22b   : > { %p10_p5 = scmp.ge.s32.totalorder %s13_s12, 4  }
 0x22d   :  { %12 = sbr.rel (!%p10_p5) target bundleno = 1 (0x1), region = 65 }

// kernel: out_conv.3
= control target key start
LH: loop header
LB: loop body
LE: loop exit
PB: predicated region body
PF: predicated region fallthrough
CT: control target
= control target key end

     0   :  { %s1054_s18 = smov 0   ;;  %s1136_s0 = inlined_call_operand.vmem [shape: f32[2,8,640], index: 0, kind: input, shape index: {}]   ;;  %s1137_s1 = inlined_call_operand.vmem [shape: f32[4,72], index: 1, kind: input, shape index: {}]   ;;  %s1138_s2 = inlined_call_operand.vmem [shape: f32[4,1], index: 2, kind: input, shape index: {}]   ;;  %s1139_s3 = inlined_call_operand.vmem [shape: f32[3,4], index: 3, kind: input, shape index: {}]   ;;  %s1140_s4 = inlined_call_operand.vmem [shape: f32[3,1], index: 4, kind: input, shape index: {}]   ;;  %s1141_s5 = inlined_call_operand.vmem [shape: f32[3,1024], index: 5, kind: output, shape index: {}]  }
   0x1 LB: > { %s1060_s19 = sadd.s32 4294967295, %s1012_s18   ;;  %p951_p0 = scmp.ge.s32.totalorder %s1012_s18, 1  ;;  %s1012_s18 = sphi %s1054_s18, %s15_s18  }
   0x2   : > { %p187_p1 = scmp.lt.s32.totalorder %s1012_s18, 3 }
   0x4   : > { %p188_p2 = pnand %p951_p0, %p187_p1 }
   0x5   : > { %p215_p3 = scmp.lt.s32.totalorder (!%p188_p2), %s1060_s19, 1  ;;  %s1014_s25 = smov (!%p188_p2), 90  }
   0x6   : > { %191 = sbr.rel (%p188_p2) target bundleno = 646 (0x286), region = 40  ;;  %s1015_s26 = smov (!%p188_p2), 91  }
   0x7   : > { %s1016_s27 = smov (!%p188_p2), 92   ;;  %s1017_s28 = smov (!%p188_p2), 108  }
   0x8   : > { %s1018_s29 = smov (!%p188_p2), 109   ;;  %s1019_s30 = smov (!%p188_p2), 110  }
   0x9   : > { %s1020_s6 = smov (!%p188_p2), 126   ;;  %s1022_s7 = smov (!%p188_p2), 127  }
   0xa   : > { %s953_s16 = sshll.u32 (!%p188_p2), %s1060_s19, 2 }
   0xb   : > { %s216_s20 = scalar_select %p215_p3, %s1060_s19, 1  ;;  %v1021_v5 = vmov 0.0   ;;  %v1023_v6 = vmov 0   ;;  %v535_v7 = vld [vmem:[%s1138_s2] sm:$0xf]  ;;  %vm485_vm0 = vcmask 736256  }
   0xc   : > { %609 = vmatprep.mubr.f32.mxu0 %v1021_v5  ;;  %680 = vmatprep.mubr.f32.mxu1 %v1021_v5  ;;  %vm452_vm1 = vcmask 744448   ;;  %vm419_vm2 = vcmask 752640   ;;  %vm386_vm3 = vcmask 883712   ;;  %vm353_vm4 = vcmask 891904   ;;  %p221_p4 = scmp.lt.s32.totalorder %s953_s16, 7 }
   0xd   : > { %s969_s21 = smul.u32 40, %s216_s20  ;;  %988 = vset.pattern.permute.xlu0 %v1023_v6  ;;  %989 = vset.pattern.permute.xlu1 %v1023_v6  ;;  %vm320_vm5 = vcmask 900096   ;;  %vm287_vm6 = vcmask 1031168   ;;  %vm254_vm7 = vcmask 1039360   ;;  %vm541_vm8 = vcmask 588800  }
   0xe   : > { %vm702_vm9 = vcmask 1043456   ;;  %vm698_vm10 = vcmask 31744   ;;  %s1143_s16 = smov (!%p221_p4, %s953_s16), 7 }
   0xf   : > { %s219_s24 = scalar_lea.vmem %s1136_s0, %s969_s21  ;;  %s954_s17 = sshll.u32 %s1143_s16, 2 }
  0x10   : > { %v1069_v0 = vld [vmem:[%s219_s24 + $0x8] sm:$0xff]  ;;  %v1071_v1 = vld [vmem:[%s219_s24] sm:$0xff]  ;;  %v1075_v2 = vld [vmem:[%s219_s24 + $0x10] sm:$0xff]  ;;  %s224_s22 = scalar_lea.vmem %s1141_s5, %s954_s17 }
  0x11   : > { %477 = vrot.lane.b32.xlu0 %v1069_v0, %s1014_s25  ;;  %475 = vrot.lane.b32.xlu1 %v1071_v1, %s1014_s25  ;;  %v1077_v3 = vld [vmem:[%s219_s24 + $0x18] sm:$0xff]  ;;  %v469_v4 = vld [vmem:[%s219_s24 + $0x20] sm:$0xff] }
  0x15   : > { %479 = vrot.lane.b32.xlu0 %v1075_v2, %s1014_s25  ;;  %481 = vrot.lane.b32.xlu1 %v1077_v3, %s1014_s25 }
  0x19   : > { %483 = vrot.lane.b32.xlu0 %v469_v4, %s1014_s25  ;;  %444 = vrot.lane.b32.xlu1 %v1069_v0, %s1015_s26 }
  0x1d   : > { %446 = vrot.lane.b32.xlu0 %v1075_v2, %s1015_s26  ;;  %442 = vrot.lane.b32.xlu1 %v1071_v1, %s1015_s26 }
  0x21   : > { %448 = vrot.lane.b32.xlu0 %v1077_v3, %s1015_s26  ;;  %450 = vrot.lane.b32.xlu1 %v469_v4, %s1015_s26 }
  0x25   : > { %413 = vrot.lane.b32.xlu1 %v1075_v2, %s1016_s27  ;;  %411 = vrot.lane.b32.xlu0 %v1069_v0, %s1016_s27 }
  0x29   : > { %415 = vrot.lane.b32.xlu1 %v1077_v3, %s1016_s27  ;;  %409 = vrot.lane.b32.xlu0 %v1071_v1, %s1016_s27 }
  0x2d   : > { %417 = vrot.lane.b32.xlu0 %v469_v4, %s1016_s27  ;;  %378 = vrot.lane.b32.xlu1 %v1069_v0, %s1017_s28 }
  0x31   : > { %380 = vrot.lane.b32.xlu0 %v1075_v2, %s1017_s28  ;;  %376 = vrot.lane.b32.xlu1 %v1071_v1, %s1017_s28 }
  0x35   : > { %382 = vrot.lane.b32.xlu0 %v1077_v3, %s1017_s28  ;;  %384 = vrot.lane.b32.xlu1 %v469_v4, %s1017_s28 }
  0x39   : > { %347 = vrot.lane.b32.xlu1 %v1075_v2, %s1018_s29  ;;  %345 = vrot.lane.b32.xlu0 %v1069_v0, %s1018_s29 }
  0x3d   : > { %349 = vrot.lane.b32.xlu1 %v1077_v3, %s1018_s29  ;;  %343 = vrot.lane.b32.xlu0 %v1071_v1, %s1018_s29 }
  0x41   : > { %351 = vrot.lane.b32.xlu0 %v469_v4, %s1018_s29  ;;  %312 = vrot.lane.b32.xlu1 %v1069_v0, %s1019_s30 }
  0x45   : > { %314 = vrot.lane.b32.xlu0 %v1075_v2, %s1019_s30  ;;  %310 = vrot.lane.b32.xlu1 %v1071_v1, %s1019_s30 }
  0x49   : > { %316 = vrot.lane.b32.xlu0 %v1077_v3, %s1019_s30  ;;  %318 = vrot.lane.b32.xlu1 %v469_v4, %s1019_s30 }
  0x4d   : > { %281 = vrot.lane.b32.xlu1 %v1075_v2, %s1020_s6  ;;  %279 = vrot.lane.b32.xlu0 %v1069_v0, %s1020_s6 }
  0x51   : > { %283 = vrot.lane.b32.xlu1 %v1077_v3, %s1020_s6  ;;  %277 = vrot.lane.b32.xlu0 %v1071_v1, %s1020_s6 }
  0x55   : > { %285 = vrot.lane.b32.xlu0 %v469_v4, %s1020_s6  ;;  %246 = vrot.lane.b32.xlu1 %v1069_v0, %s1022_s7 }
  0x59   : > { %248 = vrot.lane.b32.xlu0 %v1075_v2, %s1022_s7  ;;  %244 = vrot.lane.b32.xlu1 %v1071_v1, %s1022_s7 }
  0x5d   : > { %250 = vrot.lane.b32.xlu0 %v1077_v3, %s1022_s7  ;;  %252 = vrot.lane.b32.xlu1 %v469_v4, %s1022_s7 }
  0x61   : > { %538 = vperm.xlu0 %988, %v535_v7  }
  0x83   : > { %v478_v8 = vpop.permute.xlu0 %477  ;;  %v476_v9 = vpop.permute.xlu1 %475 }
  0x84   : > { %v486_v13 = vsel %vm485_vm0, %v476_v9, %v478_v8 }
  0x87   : > { %v480_v10 = vpop.permute.xlu0 %479  ;;  %v482_v11 = vpop.permute.xlu1 %481 }
  0x88   : > { %v487_v12 = vsel %vm485_vm0, %v478_v8, %v480_v10  ;;  %v488_v17 = vsel %vm485_vm0, %v480_v10, %v482_v11 }
  0x89   : > { %559 = vmatprep.subr.mxu0 %v487_v12 }
  0x8a   : > { %560 = vmatpush1.msra.mxu0 %v486_v13 }
  0x8b   : > { %v484_v14 = vpop.permute.xlu0 %483  ;;  %v445_v15 = vpop.permute.xlu1 %444 }
  0x8c   : > { %v489_v16 = vsel %vm485_vm0, %v482_v11, %v484_v14 }
  0x8d   : > { %630 = vmatprep.subr.mxu1 %v489_v16 }
  0x8e   : > { %631 = vmatpush1.msra.mxu1 %v488_v17  ;;  %v498_v17 = vld [vmem:[%s1137_s1] sm:$0xf] }
  0x8f   : > { %v447_v18 = vpop.permute.xlu0 %446  ;;  %v443_v19 = vpop.permute.xlu1 %442 }
  0x90   : > { %v454_v20 = vsel %vm452_vm1, %v445_v15, %v447_v18  ;;  %v453_v21 = vsel %vm452_vm1, %v443_v19, %v445_v15 }
  0x91   : > { %561 = vmatprep.subr.mxu0 %v454_v20 }
  0x92   : > { %562 = vmatpush1.msra.mxu0 %v453_v21 }
  0x93   : > { %v449_v22 = vpop.permute.xlu0 %448  ;;  %v451_v23 = vpop.permute.xlu1 %450 }
  0x94   : > { %v456_v24 = vsel %vm452_vm1, %v449_v22, %v451_v23  ;;  %v455_v25 = vsel %vm452_vm1, %v447_v18, %v449_v22 }
  0x95   : > { %632 = vmatprep.subr.mxu1 %v456_v24 }
  0x96   : > { %633 = vmatpush1.msra.mxu1 %v455_v25 }
  0x97   : > { %v414_v26 = vpop.permute.xlu1 %413  ;;  %v412_v27 = vpop.permute.xlu0 %411 }
  0x98   : > { %v421_v28 = vsel %vm419_vm2, %v412_v27, %v414_v26 }
  0x99   : > { %563 = vmatprep.subr.mxu0 %v421_v28 }
  0x9b   : > { %v416_v29 = vpop.permute.xlu1 %415  ;;  %v410_v30 = vpop.permute.xlu0 %409 }
  0x9c   : > { %v420_v31 = vsel %vm419_vm2, %v410_v30, %v412_v27  ;;  %v422_v35 = vsel %vm419_vm2, %v414_v26, %v416_v29 }
  0x9d   : > { %564 = vmatpush1.msra.mxu0 %v420_v31 }
  0x9f   : > { %v418_v32 = vpop.permute.xlu0 %417  ;;  %v379_v33 = vpop.permute.xlu1 %378 }
  0xa0   : > { %v423_v34 = vsel %vm419_vm2, %v416_v29, %v418_v32 }
  0xa1   : > { %634 = vmatprep.subr.mxu1 %v423_v34 }
  0xa2   : > { %635 = vmatpush1.msra.mxu1 %v422_v35 }
  0xa3   : > { %v381_v36 = vpop.permute.xlu0 %380  ;;  %v377_v37 = vpop.permute.xlu1 %376 }
  0xa4   : > { %v388_v38 = vsel %vm386_vm3, %v379_v33, %v381_v36  ;;  %v387_v39 = vsel %vm386_vm3, %v377_v37, %v379_v33 }
  0xa5   : > { %565 = vmatprep.subr.mxu0 %v388_v38 }
  0xa6   : > { %566 = vmatpush1.msra.mxu0 %v387_v39 }
  0xa7   : > { %v383_v40 = vpop.permute.xlu0 %382  ;;  %v385_v41 = vpop.permute.xlu1 %384 }
  0xa8   : > { %v390_v42 = vsel %vm386_vm3, %v383_v40, %v385_v41  ;;  %v389_v43 = vsel %vm386_vm3, %v381_v36, %v383_v40 }
  0xa9   : > { %636 = vmatprep.subr.mxu1 %v390_v42 }
  0xaa   : > { %637 = vmatpush1.msra.mxu1 %v389_v43 }
  0xab   : > { %v348_v44 = vpop.permute.xlu1 %347  ;;  %v346_v45 = vpop.permute.xlu0 %345 }
  0xac   : > { %v355_v46 = vsel %vm353_vm4, %v346_v45, %v348_v44 }
  0xad   : > { %567 = vmatprep.subr.mxu0 %v355_v46 }
  0xaf   : > { %v350_v47 = vpop.permute.xlu1 %349  ;;  %v344_v48 = vpop.permute.xlu0 %343 }
  0xb0   : > { %v354_v49 = vsel %vm353_vm4, %v344_v48, %v346_v45  ;;  %v356_v53 = vsel %vm353_vm4, %v348_v44, %v350_v47 }
  0xb1   : > { %568 = vmatpush1.msra.mxu0 %v354_v49 }
  0xb3   : > { %v352_v50 = vpop.permute.xlu0 %351  ;;  %v313_v51 = vpop.permute.xlu1 %312 }
  0xb4   : > { %v357_v52 = vsel %vm353_vm4, %v350_v47, %v352_v50 }
  0xb5   : > { %638 = vmatprep.subr.mxu1 %v357_v52 }
  0xb6   : > { %639 = vmatpush1.msra.mxu1 %v356_v53 }
  0xb7   : > { %v315_v54 = vpop.permute.xlu0 %314  ;;  %v311_v55 = vpop.permute.xlu1 %310 }
  0xb8   : > { %v322_v56 = vsel %vm320_vm5, %v313_v51, %v315_v54  ;;  %v321_v57 = vsel %vm320_vm5, %v311_v55, %v313_v51 }
  0xb9   : > { %569 = vmatprep.subr.mxu0 %v322_v56 }
  0xba   : > { %570 = vmatpush1.msra.mxu0 %v321_v57 }
  0xbb   : > { %v317_v58 = vpop.permute.xlu0 %316  ;;  %v319_v59 = vpop.permute.xlu1 %318 }
  0xbc   : > { %v324_v60 = vsel %vm320_vm5, %v317_v58, %v319_v59  ;;  %v323_v61 = vsel %vm320_vm5, %v315_v54, %v317_v58 }
  0xbd   : > { %640 = vmatprep.subr.mxu1 %v324_v60 }
  0xbe   : > { %641 = vmatpush1.msra.mxu1 %v323_v61 }
  0xbf   : > { %v282_v62 = vpop.permute.xlu1 %281  ;;  %v280_v63 = vpop.permute.xlu0 %279 }
  0xc0   : > { %v289_v4 = vsel %vm287_vm6, %v280_v63, %v282_v62 }
  0xc1   : > { %571 = vmatprep.subr.mxu0 %v289_v4 }
  0xc3   : > { %v284_v6 = vpop.permute.xlu1 %283  ;;  %v278_v7 = vpop.permute.xlu0 %277 }
  0xc4   : > { %v288_v8 = vsel %vm287_vm6, %v278_v7, %v280_v63  ;;  %v290_v12 = vsel %vm287_vm6, %v282_v62, %v284_v6 }
  0xc5   : > { %572 = vmatpush1.msra.mxu0 %v288_v8 }
  0xc7   : > { %v286_v9 = vpop.permute.xlu0 %285  ;;  %v247_v10 = vpop.permute.xlu1 %246 }
  0xc8   : > { %v291_v11 = vsel %vm287_vm6, %v284_v6, %v286_v9 }
  0xc9   : > { %642 = vmatprep.subr.mxu1 %v291_v11 }
  0xca   : > { %643 = vmatpush1.msra.mxu1 %v290_v12 }
  0xcb   : > { %v249_v13 = vpop.permute.xlu0 %248  ;;  %v245_v14 = vpop.permute.xlu1 %244 }
  0xcc   : > { %v256_v15 = vsel %vm254_vm7, %v247_v10, %v249_v13  ;;  %v255_v16 = vsel %vm254_vm7, %v245_v14, %v247_v10 }
  0xcd   : > { %573 = vmatprep.subr.mxu0 %v256_v15 }
  0xce   : > { %574 = vmatpush1.msra.mxu0 %v255_v16 }
  0xcf   : > { %v251_v18 = vpop.permute.xlu0 %250  ;;  %v253_v19 = vpop.permute.xlu1 %252  ;;  %575 = vmatprep.subr.mxu0 %v1069_v0  ;;  %v692_v0 = vld [vmem:[%s1140_s4] sm:$0x7] }
  0xd0   : > { %576 = vmatpush1.msra.mxu0 %v1071_v1  ;;  %v258_v20 = vsel %vm254_vm7, %v251_v18, %v253_v19  ;;  %v257_v21 = vsel %vm254_vm7, %v249_v13, %v251_v18  ;;  %695 = vperm.xlu1 %989, %v692_v0  }
  0xd1   : > { %955 = vmatmul.mubr.msk.f32.vlgmr.msra.gmra.mxu0 %vm541_vm8, %v498_v17  ;;  %644 = vmatprep.subr.mxu1 %v258_v20 }
  0xd2   : > { %645 = vmatpush1.msra.mxu1 %v257_v21  ;;  %779 = vmatprep.mubr.f32.mxu0 %v1021_v5 }
  0xd3   : > { %646 = vmatprep.subr.mxu1 %v1077_v3 }
  0xd4   : > { %647 = vmatpush1.msra.mxu1 %v1075_v2  ;;  %v691_v2 = vld [vmem:[%s1139_s3] sm:$0x7] }
  0xd5   : > { %956 = vmatmul.mubr.msk.f32.vlgmr.msra.gmra.mxu1 %vm541_vm8, %v498_v17 }
  0xd6   : > { %850 = vmatprep.mubr.f32.mxu1 %v1021_v5 }
  0xdc   : > { %v539_v1 = vpop.permute.xlu0 %538 }
 0x14b   : > { %v696_v32 = vpop.permute.xlu1 %695 }
 0x191   : > { %v611_v22 = vpop.f32.mrf.mxu0 }
 0x192   : > { %v612_v23 = vadd.f32 %v611_v22, %v539_v1 }
 0x193   : > { %v613_v24 = vpop.f32.mrf.mxu0 }
 0x194   : > { %v614_v25 = vadd.f32 %v613_v24, %v539_v1  ;;  %v687_v26 = vmax.f32 %v612_v23, 0.0 }
 0x195   : > { %v682_v27 = vpop.f32.mrf.mxu1 }
 0x196   : > { %v688_v28 = vmax.f32 %v614_v25, 0.0  ;;  %v683_v3 = vadd.f32 %v682_v27, %v539_v1 }
 0x197   : > { %v684_v29 = vpop.f32.mrf.mxu1 }
 0x198   : > { %v685_v5 = vadd.f32 %v684_v29, %v539_v1  ;;  %957 = vmatprep.subr.msk.mxu0 %vm702_vm9, %v688_v28  ;;  %v689_v31 = vmax.f32 %v683_v3, 0.0 }
 0x199   : > { %958 = vmatpush1.msk.msra.mxu0 %vm702_vm9, %v687_v26 }
 0x19a   : > { %v690_v30 = vmax.f32 %v685_v5, 0.0  ;;  %959 = vmatmul.mubr.msk.f32.vlgmr.msra.gmra.mxu0 %vm698_vm10, %v691_v2 }
 0x19c   : > { %960 = vmatprep.subr.msk.mxu1 %vm702_vm9, %v690_v30 }
 0x19d   : > { %961 = vmatpush1.msk.msra.mxu1 %vm702_vm9, %v689_v31 }
 0x19e   : > { %962 = vmatmul.mubr.msk.f32.vlgmr.msra.gmra.mxu1 %vm698_vm10, %v691_v2 }
 0x25a   : > { %v781_v33 = vpop.f32.mrf.mxu0 }
 0x25b   : > { %v782_v34 = vadd.f32 %v781_v33, %v696_v32 }
 0x25c   : > { %v783_v35 = vpop.f32.mrf.mxu0 }
 0x25d   : > { %v963_v36 = vmul.f32 -1.442695, %v782_v34  ;;  %v784_v37 = vadd.f32 %v783_v35, %v696_v32 }
 0x25e   : > { %v852_v38 = vpop.f32.mrf.mxu1 }
 0x25f   : > { %v853_v39 = vadd.f32 %v852_v38, %v696_v32  ;;  %990 = vpow2.f32 %v963_v36  ;;  %v964_v40 = vmul.f32 -1.442695, %v784_v37 }
 0x260   : > { %v854_v41 = vpop.f32.mrf.mxu1 }
 0x261   : > { %v965_v42 = vmul.f32 -1.442695, %v853_v39  ;;  %992 = vpow2.f32 %v964_v40  ;;  %v855_v43 = vadd.f32 %v854_v41, %v696_v32 }
 0x263   : > { %994 = vpow2.f32 %v965_v42  ;;  %v966_v44 = vmul.f32 -1.442695, %v855_v43 }
 0x265   : > { %996 = vpow2.f32 %v966_v44 }
 0x26c   : > { %v991_v45 = vpop.eup %990 }
 0x26d   : > { %v869_v46 = vadd.f32 1.0, %v991_v45 }
 0x26e   : > { %v993_v47 = vpop.eup %992 }
 0x26f   : > { %998 = vrcp.f32 %v869_v46  ;;  %v870_v48 = vadd.f32 1.0, %v993_v47 }
 0x270   : > { %v995_v49 = vpop.eup %994 }
 0x271   : > { %v871_v50 = vadd.f32 1.0, %v995_v49  ;;  %1000 = vrcp.f32 %v870_v48 }
 0x272   : > { %v997_v51 = vpop.eup %996 }
 0x273   : > { %v872_v52 = vadd.f32 1.0, %v997_v51  ;;  %1002 = vrcp.f32 %v871_v50 }
 0x275   : > { %1004 = vrcp.f32 %v872_v52 }
 0x27c   : > { %v999_v53 = vpop.eup %998 }
 0x27e   : > { %v1001_v54 = vpop.eup %1000 }
 0x27f   : > { %v885_v55 = vcombine.low %v999_v53, %v1001_v54 }
 0x280   : > { %v1003_v56 = vpop.eup %1002 }
 0x281   : > { %889 = vst [vmem:[%s224_s22] sm:$0x77] %v885_v55 }
 0x282   : > { %v1005_v57 = vpop.eup %1004 }
 0x283   : > { %v886_v58 = vcombine.low %v1003_v56, %v1005_v57 }
 0x285   : > { %890 = vst [vmem:[%s224_s22 + $0x8] sm:$0x77] %v886_v58 }
 0x286 PF: > { %s15_s18 = sadd.s32 1, %s1012_s18  }
 0x287   : > { %p12_p5 = scmp.ge.s32.totalorder %s15_s18, 4  }
 0x289   :  { %14 = sbr.rel (!%p12_p5) target bundleno = 1 (0x1), region = 70 }

</bundles_post_ra>
